<compile_context>
chip_gen: v7x
topology: tpu7x:2x2x1
jax: 0.10.0
libtpu: 0.0.40
codegen_flags: <defaults>
</compile_context>

<pallas_src>
import jax
import jax.numpy as jnp
from jax.experimental import pallas as pl
from jax.experimental.pallas import tpu as pltpu


def _cdiv(a, b):
    return (a + b - 1) // b


def _round_up(a, b):
    return _cdiv(a, b) * b


# ---------------------------------------------------------------------------
# Dice: per-channel partial sums (softmax + one-hot, VPU-only accumulation)
# ---------------------------------------------------------------------------
def _dice_sums_kernel(logits_ref, labels_ref, o_ref, acc_i, acc_g, acc_p):
    j = pl.program_id(2)

    @pl.when(j == 0)
    def _():
        acc_i[...] = jnp.zeros_like(acc_i)
        acc_g[...] = jnp.zeros_like(acc_g)
        acc_p[...] = jnp.zeros_like(acc_p)

    x = logits_ref[...].astype(jnp.float32)        # (C, S, L), cast in-kernel
    lbl = labels_ref[...].astype(jnp.int32)        # (1, S, L), int8 -> int32
    C, S, L = x.shape

    # Softmax over the channel axis. C is a leading (non-sublane) dim, so the
    # max / sum across channels are plain element-wise VPU ops across C slabs.
    m = jnp.max(x, axis=0, keepdims=True)          # (1, S, L)
    e = jnp.exp(x - m)
    denom = jnp.sum(e, axis=0, keepdims=True)
    probs = e * pl.reciprocal(denom, approx=True)  # (C, S, L)  EUP rcp, no divide

    cls = jax.lax.broadcasted_iota(jnp.int32, x.shape, 0)
    onehot = (cls == lbl).astype(jnp.float32)      # pad label (-1) -> all-zero

    # Fold the S sublane-chunk axis down to 8 rows with a tile-aligned VPU
    # tree-add (keeps the accumulators small and avoids any XLU work here).
    def fold(a):                                   # (C, S, L) -> (C, 8, L)
        parts = [a[:, k * 8:(k + 1) * 8, :] for k in range(S // 8)]
        while len(parts) > 1:
            nxt = [parts[i] + parts[i + 1] for i in range(0, len(parts) - 1, 2)]
            if len(parts) % 2:
                nxt.append(parts[-1])
            parts = nxt
        return parts[0]

    acc_i[...] += fold(onehot * probs)
    acc_g[...] += fold(onehot)
    acc_p[...] += fold(probs)

    @pl.when(j == pl.num_programs(2) - 1)
    def _():
        def tot(acc):                              # (C, 8, L) -> (C, 1, 1)
            s = jnp.sum(acc[...], axis=2, keepdims=True)
            return jnp.sum(s, axis=1, keepdims=True)

        o_ref[...] = jnp.concatenate([tot(acc_i), tot(acc_g), tot(acc_p)], axis=2)


def _dice_loss(y_pred, y_true, include_background):
    N, C, H, W = y_pred.shape
    HW = H * W
    itemsize = jnp.dtype(y_pred.dtype).itemsize

    LANES = min(512, _round_up(HW, 128))
    rows_needed = _cdiv(HW, LANES)

    # Target ~4 MiB of logits per grid step; rows in multiples of 32 (int8-safe),
    # capped at 512 sublane rows per step.
    rows_for_target = max(32, (4 << 20) // (C * LANES * itemsize))
    sub = min(_round_up(rows_needed, 32), _round_up(min(rows_for_target, 512), 32))
    if rows_needed >= 64:
        # Keep at least 2 spatial steps so the P axis can feed both v7x cores.
        sub = min(sub, _round_up(_cdiv(rows_needed, 2), 32))

    steps_total = _cdiv(rows_needed, sub)
    P = 2 if steps_total >= 2 else 1               # spatial split -> megacore
    spp = _cdiv(steps_total, P)
    rows_total = P * spp * sub
    HWp = rows_total * LANES

    label_dtype = jnp.int8 if C <= 127 else jnp.int32
    logits = y_pred.reshape(N, C, HW)              # free reshape, native layout
    labels = y_true.astype(label_dtype).reshape(N, 1, HW)
    if HWp != HW:
        logits = jnp.pad(logits, ((0, 0), (0, 0), (0, HWp - HW)))
        labels = jnp.pad(labels, ((0, 0), (0, 0), (0, HWp - HW)), constant_values=-1)
    logits = logits.reshape(N, C, rows_total, LANES)
    labels = labels.reshape(N, 1, rows_total, LANES)

    partials = pl.pallas_call(
        _dice_sums_kernel,
        out_shape=jax.ShapeDtypeStruct((P, N, C, 1, 3), jnp.float32),
        grid_spec=pltpu.PrefetchScalarGridSpec(
            num_scalar_prefetch=0,
            grid=(P, N, spp),
            in_specs=[
                pl.BlockSpec((None, C, sub, LANES),
                             lambda p, n, j: (n, 0, p * spp + j, 0)),
                pl.BlockSpec((None, 1, sub, LANES),
                             lambda p, n, j: (n, 0, p * spp + j, 0)),
            ],
            out_specs=pl.BlockSpec((None, None, C, 1, 3),
                                   lambda p, n, j: (p, n, 0, 0, 0)),
            scratch_shapes=[pltpu.VMEM((C, 8, LANES), jnp.float32)] * 3,
        ),
        compiler_params=pltpu.CompilerParams(
            dimension_semantics=("parallel", "parallel", "arbitrary"),
            vmem_limit_bytes=32 * 1024 * 1024),
    )(logits, labels)

    sums = jnp.sum(partials, axis=(0, 1))[:, 0, :]          # (C, 3)
    inter, ground, pred = sums[:, 0], sums[:, 1], sums[:, 2]
    # Zero-padded pixels softmax to 1/C per channel and have label -1 (zero
    # one-hot), so only `pred` picks up pad mass: subtract it analytically.
    pred = pred - (N * (HWp - HW)) / C

    smooth_nr = smooth_dr = 1e-5
    f = 1.0 - (2.0 * inter + smooth_nr) / (ground + pred + smooth_dr)
    if not include_background:
        f = f[1:]
    return jnp.mean(f)


# ---------------------------------------------------------------------------
# Focal (gamma = 2): sigmoid focal loss, lane-dense accumulation + reduction
# ---------------------------------------------------------------------------
def _focal_sum_kernel(x_ref, t_ref, o_ref, acc_ref):
    j = pl.program_id(1)

    @pl.when(j == 0)
    def _():
        acc_ref[...] = jnp.zeros_like(acc_ref)

    x = x_ref[...].astype(jnp.float32)             # (SUB, lanes)
    t = t_ref[...].astype(jnp.float32)             # int8 {0,1} -> f32

    # z = x*(2t-1); log(p_t) = logsigmoid(z); BCEWithLogits(x,t) = -log(p_t);
    # 1 - p_t = sigmoid(-z). gamma=2 specialization: (1-p_t)^2 = s*s.
    z = x * (2.0 * t - 1.0)
    e = jnp.exp(-jnp.abs(z))
    ls = jnp.minimum(z, 0.0) - jnp.log1p(e)                        # log(p_t)
    s = jnp.where(z >= 0.0, e, 1.0) * pl.reciprocal(1.0 + e, approx=True)
    acc_ref[...] += (s * s) * (-ls)

    @pl.when(j == pl.num_programs(1) - 1)
    def _():
        o_ref[...] = jnp.sum(acc_ref[...], axis=0, keepdims=True)  # (1, lanes)


def _focal_loss(y_pred, y_true):
    N, C, H, W = y_pred.shape
    # MONAI FocalLoss(to_onehot_y=False) requires target shape == input shape;
    # after y_true.unsqueeze(1) that means C must be 1 (binary sigmoid form).
    assert C == 1, "focal path matches the PyTorch module only for single-channel preds"
    T = N * C * H * W

    SUB = 64                                       # sublane rows per grid step
    lanes = min(8192, _round_up(max(1, _cdiv(T, SUB)), 128))
    blk = SUB * lanes
    n_blocks = _cdiv(T, blk)
    n_outer = 2 if n_blocks >= 2 else 1            # megacore sharding on v7x
    inner = _cdiv(n_blocks, n_outer)
    Tp = n_outer * inner * blk

    x = y_pred.reshape(-1)
    t = y_true.astype(jnp.int8).reshape(-1)        # 1 B/elem target stream
    if Tp != T:
        # Pad with (x=+30, t=1): loss ~ sigmoid(-30)^2 * softplus(-30) ~ 0,
        # so padded elements contribute nothing and no per-element mask is needed.
        x = jnp.pad(x, (0, Tp - T), constant_values=30.0)
        t = jnp.pad(t, (0, Tp - T), constant_values=1)
    x = x.reshape(n_outer, inner * SUB, lanes)
    t = t.reshape(n_outer, inner * SUB, lanes)

    partials = pl.pallas_call(
        _focal_sum_kernel,
        out_shape=jax.ShapeDtypeStruct((n_outer, 1, lanes), jnp.float32),
        grid_spec=pltpu.PrefetchScalarGridSpec(
            num_scalar_prefetch=0,
            grid=(n_outer, inner),
            in_specs=[
                pl.BlockSpec((None, SUB, lanes), lambda o, j: (o, j, 0)),
                pl.BlockSpec((None, SUB, lanes), lambda o, j: (o, j, 0)),
            ],
            out_specs=pl.BlockSpec((None, 1, lanes), lambda o, j: (o, 0, 0)),
            scratch_shapes=[pltpu.VMEM((SUB, lanes), jnp.float32)],
        ),
        compiler_params=pltpu.CompilerParams(
            dimension_semantics=("parallel", "arbitrary"),
            vmem_limit_bytes=32 * 1024 * 1024),
    )(x, t)

    return jnp.sum(partials) / T


# ---------------------------------------------------------------------------
# MonaiLoss.forward equivalent
# ---------------------------------------------------------------------------
def monai_loss(loss, y_pred, y_true):
    """y_pred: (N, C, H, W) float logits. y_true: (N, H, W) class labels.

    Mirrors:  y_true = y_true.unsqueeze(1).float()
              'dice'  -> DiceLoss(softmax=True, to_onehot_y=True, batch=True,
                                  include_background = (C != 2))
              else    -> FocalLoss(gamma=2.0)  (sigmoid form, C == 1)
    """
    if loss == "dice":
        include_background = y_pred.shape[1] != 2
        return _dice_loss(y_pred, y_true, include_background)
    return _focal_loss(y_pred, y_true)


if __name__ == "__main__":
    key = jax.random.PRNGKey(0)
    k1, k2, k3, k4 = jax.random.split(key, 4)

    # dice path, C=4 -> include_background=True
    y_pred_d4 = jax.random.normal(k1, (2, 4, 16, 16), jnp.float32)
    y_true_d4 = jax.random.randint(k2, (2, 16, 16), 0, 4)
    dice_bg = monai_loss("dice", y_pred_d4, y_true_d4)

    # dice path, C=2 -> include_background=False
    y_pred_d2 = jax.random.normal(k3, (2, 2, 16, 16), jnp.float32)
    y_true_d2 = jax.random.randint(k4, (2, 16, 16), 0, 2)
    dice_nbg = monai_loss("dice", y_pred_d2, y_true_d2)

    # focal path, C=1 (binary targets)
    y_pred_f = jax.random.normal(k1, (2, 1, 16, 16), jnp.float32)
    y_true_f = jax.random.randint(k2, (2, 16, 16), 0, 2)
    focal = monai_loss("focal", y_pred_f, y_true_f)

    jax.block_until_ready((dice_bg, dice_nbg, focal))
    print("KERNEL_OK")
</pallas_src>

<mosaic_0001>
module attributes {stable_mosaic.version = 11 : i64} {
  func.func @_dice_sums_kernel(%arg0: i32, %arg1: i32, %arg2: i32, %arg3: memref<1x4x32x256xf32, #tpu.memory_space<vmem>>, %arg4: memref<1x1x32x256xi8, #tpu.memory_space<vmem>>, %arg5: memref<1x1x4x1x3xf32, #tpu.memory_space<vmem>>, %arg6: memref<4x8x256xf32, #tpu.memory_space<vmem>>, %arg7: memref<4x8x256xf32, #tpu.memory_space<vmem>>, %arg8: memref<4x8x256xf32, #tpu.memory_space<vmem>>) attributes {dimension_semantics = [#tpu.dimension_semantics<parallel>, #tpu.dimension_semantics<parallel>, #tpu.dimension_semantics<arbitrary>], iteration_bounds = array<i64: 1, 2, 1>, scalar_prefetch = 0 : i64, scratch_operands = 3 : i64, tpu.core_type = #tpu.core_type<tc>, window_params = [{transform_indices = @transform_0, window_bounds = array<i64: 1, 4, 32, 256>}, {transform_indices = @transform_1, window_bounds = array<i64: 1, 1, 32, 256>}, {transform_indices = @transform_2, window_bounds = array<i64: 1, 1, 4, 1, 3>}]} {
    %c0_i32 = arith.constant 0 : i32
    %0 = arith.cmpi eq, %arg2, %c0_i32 : i32
    %1 = arith.extui %0 : i1 to i32
    %c0_i32_0 = arith.constant 0 : i32
    %2 = arith.cmpi ne, %1, %c0_i32_0 : i32
    scf.if %2 {
      %cst_29 = arith.constant 0.000000e+00 : f32
      %57 = vector.broadcast %cst_29 : f32 to vector<4x8x256xf32>
      %c0_30 = arith.constant 0 : index
      %c0_31 = arith.constant 0 : index
      %c0_32 = arith.constant 0 : index
      %58 = vector.load %arg6[%c0_30, %c0_31, %c0_32] : memref<4x8x256xf32, #tpu.memory_space<vmem>>, vector<4x8x256xf32>
      tpu.vector_store %arg6[%c0_30, %c0_31, %c0_32], %57 {strides = array<i32>} : memref<4x8x256xf32, #tpu.memory_space<vmem>>, vector<4x8x256xf32>,
      %cst_33 = arith.constant 0.000000e+00 : f32
      %59 = vector.broadcast %cst_33 : f32 to vector<4x8x256xf32>
      %c0_34 = arith.constant 0 : index
      %c0_35 = arith.constant 0 : index
      %c0_36 = arith.constant 0 : index
      %60 = vector.load %arg7[%c0_34, %c0_35, %c0_36] : memref<4x8x256xf32, #tpu.memory_space<vmem>>, vector<4x8x256xf32>
      tpu.vector_store %arg7[%c0_34, %c0_35, %c0_36], %59 {strides = array<i32>} : memref<4x8x256xf32, #tpu.memory_space<vmem>>, vector<4x8x256xf32>,
      %cst_37 = arith.constant 0.000000e+00 : f32
      %61 = vector.broadcast %cst_37 : f32 to vector<4x8x256xf32>
      %c0_38 = arith.constant 0 : index
      %c0_39 = arith.constant 0 : index
      %c0_40 = arith.constant 0 : index
      %62 = vector.load %arg8[%c0_38, %c0_39, %c0_40] : memref<4x8x256xf32, #tpu.memory_space<vmem>>, vector<4x8x256xf32>
      tpu.vector_store %arg8[%c0_38, %c0_39, %c0_40], %61 {strides = array<i32>} : memref<4x8x256xf32, #tpu.memory_space<vmem>>, vector<4x8x256xf32>,
    } else {
    }
    %c0 = arith.constant 0 : index
    %c0_1 = arith.constant 0 : index
    %c0_2 = arith.constant 0 : index
    %c0_3 = arith.constant 0 : index
    %3 = vector.load %arg3[%c0, %c0_1, %c0_2, %c0_3] : memref<1x4x32x256xf32, #tpu.memory_space<vmem>>, vector<1x4x32x256xf32>
    %4 = vector.shape_cast %3 : vector<1x4x32x256xf32> to vector<4x32x256xf32>
    %c0_4 = arith.constant 0 : index
    %c0_5 = arith.constant 0 : index
    %c0_6 = arith.constant 0 : index
    %c0_7 = arith.constant 0 : index
    %5 = vector.load %arg4[%c0_4, %c0_5, %c0_6, %c0_7] : memref<1x1x32x256xi8, #tpu.memory_space<vmem>>, vector<1x1x32x256xi8>
    %6 = vector.shape_cast %5 : vector<1x1x32x256xi8> to vector<1x32x256xi8>
    %7 = arith.extsi %6 : vector<1x32x256xi8> to vector<1x32x256xi32>
    %cst = arith.constant dense<0xFF800000> : vector<32x256xf32>
    %8 = vector.multi_reduction <maximumf>, %4, %cst [0] : vector<4x32x256xf32> to vector<32x256xf32>
    %9 = vector.shape_cast %8 : vector<32x256xf32> to vector<1x32x256xf32>
    %10 = vector.broadcast %9 : vector<1x32x256xf32> to vector<4x32x256xf32>
    %11 = arith.subf %4, %10 : vector<4x32x256xf32>
    %12 = math.exp %11 : vector<4x32x256xf32>
    %cst_8 = arith.constant dense<0.000000e+00> : vector<32x256xf32>
    %13 = vector.multi_reduction <add>, %12, %cst_8 [0] : vector<4x32x256xf32> to vector<32x256xf32>
    %14 = vector.shape_cast %13 : vector<32x256xf32> to vector<1x32x256xf32>
    %15 = tpu.reciprocal %14 {approx = true} : vector<1x32x256xf32> -> vector<1x32x256xf32>
    %16 = vector.broadcast %15 : vector<1x32x256xf32> to vector<4x32x256xf32>
    %17 = arith.mulf %12, %16 : vector<4x32x256xf32>
    %18 = tpu.iota {dimensions = array<i32: 0>} : vector<4x32x256xi32>
    %19 = vector.broadcast %7 : vector<1x32x256xi32> to vector<4x32x256xi32>
    %20 = arith.cmpi eq, %18, %19 : vector<4x32x256xi32>
    %21 = arith.extui %20 : vector<4x32x256xi1> to vector<4x32x256xi32>
    %22 = arith.sitofp %21 : vector<4x32x256xi32> to vector<4x32x256xf32>
    %c0_9 = arith.constant 0 : index
    %c0_10 = arith.constant 0 : index
    %c0_11 = arith.constant 0 : index
    %23 = vector.load %arg6[%c0_9, %c0_10, %c0_11] : memref<4x8x256xf32, #tpu.memory_space<vmem>>, vector<4x8x256xf32>
    %24 = arith.mulf %22, %17 : vector<4x32x256xf32>
    %25 = vector.extract_strided_slice %24 {offsets = [0, 0, 0], sizes = [4, 8, 256], strides = [1, 1, 1]} : vector<4x32x256xf32> to vector<4x8x256xf32>
    %26 = vector.extract_strided_slice %24 {offsets = [0, 8, 0], sizes = [4, 8, 256], strides = [1, 1, 1]} : vector<4x32x256xf32> to vector<4x8x256xf32>
    %27 = vector.extract_strided_slice %24 {offsets = [0, 16, 0], sizes = [4, 8, 256], strides = [1, 1, 1]} : vector<4x32x256xf32> to vector<4x8x256xf32>
    %28 = vector.extract_strided_slice %24 {offsets = [0, 24, 0], sizes = [4, 8, 256], strides = [1, 1, 1]} : vector<4x32x256xf32> to vector<4x8x256xf32>
    %29 = arith.addf %25, %26 : vector<4x8x256xf32>
    %30 = arith.addf %27, %28 : vector<4x8x256xf32>
    %31 = arith.addf %29, %30 : vector<4x8x256xf32>
    %32 = arith.addf %23, %31 : vector<4x8x256xf32>
    %c0_12 = arith.constant 0 : index
    %c0_13 = arith.constant 0 : index
    %c0_14 = arith.constant 0 : index
    %33 = vector.load %arg6[%c0_12, %c0_13, %c0_14] : memref<4x8x256xf32, #tpu.memory_space<vmem>>, vector<4x8x256xf32>
    tpu.vector_store %arg6[%c0_12, %c0_13, %c0_14], %32 {strides = array<i32>} : memref<4x8x256xf32, #tpu.memory_space<vmem>>, vector<4x8x256xf32>,
    %c0_15 = arith.constant 0 : index
    %c0_16 = arith.constant 0 : index
    %c0_17 = arith.constant 0 : index
    %34 = vector.load %arg7[%c0_15, %c0_16, %c0_17] : memref<4x8x256xf32, #tpu.memory_space<vmem>>, vector<4x8x256xf32>
    %35 = vector.extract_strided_slice %22 {offsets = [0, 0, 0], sizes = [4, 8, 256], strides = [1, 1, 1]} : vector<4x32x256xf32> to vector<4x8x256xf32>
    %36 = vector.extract_strided_slice %22 {offsets = [0, 8, 0], sizes = [4, 8, 256], strides = [1, 1, 1]} : vector<4x32x256xf32> to vector<4x8x256xf32>
    %37 = vector.extract_strided_slice %22 {offsets = [0, 16, 0], sizes = [4, 8, 256], strides = [1, 1, 1]} : vector<4x32x256xf32> to vector<4x8x256xf32>
    %38 = vector.extract_strided_slice %22 {offsets = [0, 24, 0], sizes = [4, 8, 256], strides = [1, 1, 1]} : vector<4x32x256xf32> to vector<4x8x256xf32>
    %39 = arith.addf %35, %36 : vector<4x8x256xf32>
    %40 = arith.addf %37, %38 : vector<4x8x256xf32>
    %41 = arith.addf %39, %40 : vector<4x8x256xf32>
    %42 = arith.addf %34, %41 : vector<4x8x256xf32>
    %c0_18 = arith.constant 0 : index
    %c0_19 = arith.constant 0 : index
    %c0_20 = arith.constant 0 : index
    %43 = vector.load %arg7[%c0_18, %c0_19, %c0_20] : memref<4x8x256xf32, #tpu.memory_space<vmem>>, vector<4x8x256xf32>
    tpu.vector_store %arg7[%c0_18, %c0_19, %c0_20], %42 {strides = array<i32>} : memref<4x8x256xf32, #tpu.memory_space<vmem>>, vector<4x8x256xf32>,
    %c0_21 = arith.constant 0 : index
    %c0_22 = arith.constant 0 : index
    %c0_23 = arith.constant 0 : index
    %44 = vector.load %arg8[%c0_21, %c0_22, %c0_23] : memref<4x8x256xf32, #tpu.memory_space<vmem>>, vector<4x8x256xf32>
    %45 = vector.extract_strided_slice %17 {offsets = [0, 0, 0], sizes = [4, 8, 256], strides = [1, 1, 1]} : vector<4x32x256xf32> to vector<4x8x256xf32>
    %46 = vector.extract_strided_slice %17 {offsets = [0, 8, 0], sizes = [4, 8, 256], strides = [1, 1, 1]} : vector<4x32x256xf32> to vector<4x8x256xf32>
    %47 = vector.extract_strided_slice %17 {offsets = [0, 16, 0], sizes = [4, 8, 256], strides = [1, 1, 1]} : vector<4x32x256xf32> to vector<4x8x256xf32>
    %48 = vector.extract_strided_slice %17 {offsets = [0, 24, 0], sizes = [4, 8, 256], strides = [1, 1, 1]} : vector<4x32x256xf32> to vector<4x8x256xf32>
    %49 = arith.addf %45, %46 : vector<4x8x256xf32>
    %50 = arith.addf %47, %48 : vector<4x8x256xf32>
    %51 = arith.addf %49, %50 : vector<4x8x256xf32>
    %52 = arith.addf %44, %51 : vector<4x8x256xf32>
    %c0_24 = arith.constant 0 : index
    %c0_25 = arith.constant 0 : index
    %c0_26 = arith.constant 0 : index
    %53 = vector.load %arg8[%c0_24, %c0_25, %c0_26] : memref<4x8x256xf32, #tpu.memory_space<vmem>>, vector<4x8x256xf32>
    tpu.vector_store %arg8[%c0_24, %c0_25, %c0_26], %52 {strides = array<i32>} : memref<4x8x256xf32, #tpu.memory_space<vmem>>, vector<4x8x256xf32>,
    %c0_i32_27 = arith.constant 0 : i32
    %54 = arith.cmpi eq, %arg2, %c0_i32_27 : i32
    %55 = arith.extui %54 : i1 to i32
    %c0_i32_28 = arith.constant 0 : i32
    %56 = arith.cmpi ne, %55, %c0_i32_28 : i32
    scf.if %56 {
      %c0_29 = arith.constant 0 : index
      %c0_30 = arith.constant 0 : index
      %c0_31 = arith.constant 0 : index
      %57 = vector.load %arg6[%c0_29, %c0_30, %c0_31] : memref<4x8x256xf32, #tpu.memory_space<vmem>>, vector<4x8x256xf32>
      %cst_32 = arith.constant dense<0.000000e+00> : vector<4x8xf32>
      %58 = vector.multi_reduction <add>, %57, %cst_32 [2] : vector<4x8x256xf32> to vector<4x8xf32>
      %59 = vector.shape_cast %58 : vector<4x8xf32> to vector<4x8x1xf32>
      %cst_33 = arith.constant dense<0.000000e+00> : vector<4x1xf32>
      %60 = vector.multi_reduction <add>, %59, %cst_33 [1] : vector<4x8x1xf32> to vector<4x1xf32>
      %61 = vector.shape_cast %60 : vector<4x1xf32> to vector<4x1x1xf32>
      %c0_34 = arith.constant 0 : index
      %c0_35 = arith.constant 0 : index
      %c0_36 = arith.constant 0 : index
      %62 = vector.load %arg7[%c0_34, %c0_35, %c0_36] : memref<4x8x256xf32, #tpu.memory_space<vmem>>, vector<4x8x256xf32>
      %cst_37 = arith.constant dense<0.000000e+00> : vector<4x8xf32>
      %63 = vector.multi_reduction <add>, %62, %cst_37 [2] : vector<4x8x256xf32> to vector<4x8xf32>
      %64 = vector.shape_cast %63 : vector<4x8xf32> to vector<4x8x1xf32>
      %cst_38 = arith.constant dense<0.000000e+00> : vector<4x1xf32>
      %65 = vector.multi_reduction <add>, %64, %cst_38 [1] : vector<4x8x1xf32> to vector<4x1xf32>
      %66 = vector.shape_cast %65 : vector<4x1xf32> to vector<4x1x1xf32>
      %c0_39 = arith.constant 0 : index
      %c0_40 = arith.constant 0 : index
      %c0_41 = arith.constant 0 : index
      %67 = vector.load %arg8[%c0_39, %c0_40, %c0_41] : memref<4x8x256xf32, #tpu.memory_space<vmem>>, vector<4x8x256xf32>
      %cst_42 = arith.constant dense<0.000000e+00> : vector<4x8xf32>
      %68 = vector.multi_reduction <add>, %67, %cst_42 [2] : vector<4x8x256xf32> to vector<4x8xf32>
      %69 = vector.shape_cast %68 : vector<4x8xf32> to vector<4x8x1xf32>
      %cst_43 = arith.constant dense<0.000000e+00> : vector<4x1xf32>
      %70 = vector.multi_reduction <add>, %69, %cst_43 [1] : vector<4x8x1xf32> to vector<4x1xf32>
      %71 = vector.shape_cast %70 : vector<4x1xf32> to vector<4x1x1xf32>
      %72 = tpu.concatenate %61, %66, %71 in 2 : vector<4x1x1xf32>, vector<4x1x1xf32>, vector<4x1x1xf32> -> vector<4x1x3xf32>
      %c0_44 = arith.constant 0 : index
      %c0_45 = arith.constant 0 : index
      %c0_46 = arith.constant 0 : index
      %c0_47 = arith.constant 0 : index
      %c0_48 = arith.constant 0 : index
      %73 = vector.load %arg5[%c0_44, %c0_45, %c0_46, %c0_47, %c0_48] : memref<1x1x4x1x3xf32, #tpu.memory_space<vmem>>, vector<1x1x4x1x3xf32>
      %74 = vector.shape_cast %73 : vector<1x1x4x1x3xf32> to vector<4x1x3xf32>
      %75 = vector.shape_cast %72 : vector<4x1x3xf32> to vector<1x1x4x1x3xf32>
      tpu.vector_store %arg5[%c0_44, %c0_45, %c0_46, %c0_47, %c0_48], %75 {strides = array<i32>} : memref<1x1x4x1x3xf32, #tpu.memory_space<vmem>>, vector<1x1x4x1x3xf32>,
    } else {
    }
    return
  }
  func.func @transform_0(%arg0: i32, %arg1: i32, %arg2: i32) -> (i32, i32, i32, i32) {
    %c1_i32 = arith.constant 1 : i32
    %0 = arith.muli %arg0, %c1_i32 : i32
    %1 = arith.addi %0, %arg2 : i32
    %c0_i32 = arith.constant 0 : i32
    %c0_i32_0 = arith.constant 0 : i32
    %c0_i32_1 = arith.constant 0 : i32
    return %arg1, %c0_i32, %1, %c0_i32_0 : i32, i32, i32, i32
  }
  func.func @transform_1(%arg0: i32, %arg1: i32, %arg2: i32) -> (i32, i32, i32, i32) {
    %c1_i32 = arith.constant 1 : i32
    %0 = arith.muli %arg0, %c1_i32 : i32
    %1 = arith.addi %0, %arg2 : i32
    %c0_i32 = arith.constant 0 : i32
    %c0_i32_0 = arith.constant 0 : i32
    %c0_i32_1 = arith.constant 0 : i32
    return %arg1, %c0_i32, %1, %c0_i32_0 : i32, i32, i32, i32
  }
  func.func @transform_2(%arg0: i32, %arg1: i32, %arg2: i32) -> (i32, i32, i32, i32, i32) {
    %c0_i32 = arith.constant 0 : i32
    %c0_i32_0 = arith.constant 0 : i32
    %c0_i32_1 = arith.constant 0 : i32
    %c0_i32_2 = arith.constant 0 : i32
    return %arg0, %arg1, %c0_i32, %c0_i32_0, %c0_i32_1 : i32, i32, i32, i32, i32
  }
}

</mosaic_0001>

<bundles_post_ra>
// kernel: tpu_custom_call.1
= control target key start
LH: loop header
LB: loop body
LE: loop exit
PB: predicated region body
PF: predicated region fallthrough
CT: control target
= control target key end

     0   :  { %7 = vsyncpa [#allocation6], 0  ;;  %s2270_s0 = inlined_call_operand.hbm [shape: f32[2,4,32,256], index: 0, kind: input, shape index: {}]   ;;  %s2271_s1 = inlined_call_operand.hbm [shape: s8[2,1,32,256], index: 1, kind: input, shape index: {}]   ;;  %s2272_s2 = inlined_call_operand.vmem [shape: f32[1,2,4,1,3], index: 2, kind: output, shape index: {}]  }
   0x1   :  { %9 = vsyncpa [#allocation6 + $0x1], 0 }
   0x2   :  { %10 = vsyncpa [#allocation8], 0 }
   0x3   :  { %12 = vsyncpa [#allocation8 + $0x1], 0  ;;  %s1375_s9 = smov 0   ;;  %s1377_s10 = smov 0  }
   0x4   :  { %s1379_s11 = smov 0   ;;  %s1381_s12 = smov 0  }
   0x5   :  { %s1383_s13 = smov 0   ;;  %s1385_s14 = smov 0  }
   0x6 LB: > { %s1046_s15 = sadd.s32 4294967295, %s1353_s14   ;;  %s33_s16 = sadd.s32 1, %s1349_s13  ;;  %s1353_s14 = sphi %s1385_s14, %s18_s14   ;;  %s1349_s13 = sphi %s1383_s13, %s2352_s13   ;;  %s1345_s12 = sphi %s1381_s12, %s2351_s12   ;;  %s1341_s11 = sphi %s1379_s11, %s2350_s11   ;;  %s1337_s10 = sphi %s1377_s10, %s2349_s10   ;;  %s1333_s9 = sphi %s1375_s9, %s2348_s9  }
   0x7   : > { %p35_p0 = scmp.ge.s32.totalorder %s33_s16, 2  ;;  %s48_s17 = sadd.s32 1, %s1341_s11 }
   0x8   : > { %p55_p1 = scmp.ne.s32.totalorder %s1341_s11, %s1337_s10  ;;  %p56_p2 = scmp.eq.s32.totalorder %s1353_s14, 0 }
   0x9   : > { %s2354_s16 = smov (%p35_p0, %s33_s16), 0  ;;  %p61_p4 = scmp.ne.s32.totalorder %s1337_s10, %s1333_s9 }
   0xa   : > { %p1411_p3 = por %p56_p2, %p55_p1  ;;  %s43_s19 = ssub.s32 %s1349_s13, %s2354_s16 }
   0xb   : > { %p62_p5 = scmp.eq.s32.totalorder %s1046_s15, 0  ;;  %p46_p6 = scmp.eq.s32.totalorder %s43_s19, 0 }
   0xc   : > { %p1107_p8 = scmp.lt.s32.totalorder %s1353_s14, 2  ;;  %s1427_s22 = sand.u32 1, %s1341_s11  }
   0xd   : > { %p1418_p7 = por %p62_p5, %p61_p4  ;;  %s1094_s23 = sshll.u32 %s1349_s13, 12 }
   0xe   : > { %s1424_s21 = scalar_select %p46_p6, %s1341_s11, %s48_s17  }
   0xf   : > { %s2295_s20 = scalar_select %p1418_p7, 1, 0 }
  0x10   : > { %s1050_s24 = sshll.u32 %s1427_s22, 8  ;;  %s1434_s27 = scalar_lea.hbm %s2270_s0, %s1094_s23 }
  0x11   : > { %s147_s28 = scalar_lea.vmem [#allocation5], %s1050_s24  ;;  %p1438_p9 = pnand %p1107_p8, %p1411_p3 }
  0x12   : > { %s158_s29 = sshll.u32 %s147_s28, 4  ;;  %s144_s3 = scalar_lea.sflag [#allocation6], %s1427_s22  ;;  %s1442_s29 = int_to_ptr.vmem [resolvable:$true] %s158_s29 }
  0x13   : > { %s1239_s4 = scalar_lea.hbm %s1434_s27, 4096  ;;  %p1241_p11 = pneg %p1438_p9 }
  0x14   : > { %p1240_p10 = scmp.ne.s32.totalorder %s1434_s27, %s1239_s4  ;;  %s1244_s7 = scalar_lea.hbm %s2270_s0, 8192 }
  0x15   : > { %p1245_p0 = scmp.lt.u32.totalorder %s1434_s27, %s2270_s0  ;;  %p1246_p1 = scmp.lt.u32.totalorder %s1244_s7, %s1239_s4 }
  0x16   : > { %p1242_p12 = pnand %p1241_p11, %p1240_p10  ;;  %p1248_p3 = scmp.lt.u32.totalorder %s1239_s4, %s1434_s27 }
  0x17   : > { %p1247_p2 = por %p1246_p1, %p1245_p0 }
  0x18   : > { %p1243_p13 = pneg %p1242_p12 }
  0x19   : > { %p1249_p4 = por %p1248_p3, %p1247_p2 }
  0x1b   : > { %p1250_p5 = pnand %p1249_p4, %p1243_p13 }
  0x1d   : > { %1253 = shalt.err (!%p1250_p5)
}
  0x1e   : > { %s1254_s15 = scalar_lea.vmem %s1442_s29, 4096  ;;  %s1355_s17 = smov [#allocation5]  }
  0x1f   : > { %p1255_p6 = scmp.ne.s32.totalorder %s1442_s29, %s1254_s15  ;;  %s1259_s18 = sshll.u32 %s1355_s17, 4  ;;  %s1260_s18 = int_to_ptr.vmem [resolvable:$false] %s1259_s18 }
  0x20   : > { %s1261_s19 = scalar_lea.vmem %s1260_s18, 8192  ;;  %p1262_p12 = scmp.lt.s32.totalorder %s1442_s29, %s1260_s18 }
  0x21   : > { %p1257_p8 = pnand %p1255_p6, %p1241_p11  ;;  %p1263_p0 = scmp.lt.s32.totalorder %s1261_s19, %s1254_s15 }
  0x23   : > { %p1258_p10 = pneg %p1257_p8  ;;  %p1264_p1 = por %p1263_p0, %p1262_p12 }
  0x25   : > { %p1265_p2 = pnand %p1264_p1, %p1258_p10 }
  0x27   : > { %1268 = shalt.err (!%p1265_p2)
}
  0x28   : > { %s1356_s23 = smov 256   ;;  %s1357_s24 = smov 16  }
  0x29   : > { %1103 = dma.hbm_to_vmem [thread:$0]  (!%p1438_p9), %s1434_s27, 4096, %s1442_s29, %s144_s3, %s1356_s23, %s1356_s23, %s1357_s24  }
  0x2a   : > { %p1056_p13 = scmp.ge.s32.totalorder %s1353_s14, 1  ;;  %p188_p3 = scmp.lt.s32.totalorder %s1353_s14, 3 }
  0x2b   : > { %s1053_s25 = sshll.u32 %s1427_s22, 4  ;;  %s1095_s28 = sshll.u32 %s1349_s13, 8 }
  0x2c   : > { %p1475_p4 = pnand %p1056_p13, %p188_p3  ;;  %s172_s4 = scalar_lea.vmem [#allocation7], %s1053_s25 }
  0x2d   : > { %s183_s5 = sshll.u32 %s172_s4, 4  ;;  %s1483_s8 = scalar_lea.hbm %s2271_s1, %s1095_s28  ;;  %s184_s5 = int_to_ptr.vmem [resolvable:$true] %s183_s5 }
  0x2e   : > { %s2297_s26 = scalar_select %p1475_p4, 1, 0 }
  0x2f   : > { %s169_s27 = scalar_lea.sflag [#allocation8], %s1427_s22  ;;  %s1269_s29 = scalar_lea.hbm %s1483_s8, 256 }
  0x30   : > { %p1270_p5 = scmp.ne.s32.totalorder %s1483_s8, %s1269_s29  ;;  %s1274_s15 = scalar_lea.hbm %s2271_s1, 512 }
  0x31   : > { %p1275_p10 = scmp.lt.u32.totalorder %s1483_s8, %s2271_s1  ;;  %p1276_p12 = scmp.lt.u32.totalorder %s1274_s15, %s1269_s29 }
  0x32   : > { %p1272_p6 = pnand %p1270_p5, %p1241_p11  ;;  %p1278_p1 = scmp.lt.u32.totalorder %s1269_s29, %s1483_s8 }
  0x33   : > { %p1277_p0 = por %p1276_p12, %p1275_p10 }
  0x34   : > { %p1273_p8 = pneg %p1272_p6 }
  0x35   : > { %p1279_p2 = por %p1278_p1, %p1277_p0 }
  0x37   : > { %p1280_p13 = pnand %p1279_p2, %p1273_p8 }
  0x39   : > { %1283 = shalt.err (!%p1280_p13)
}
  0x3a   : > { %s1284_s22 = scalar_lea.vmem %s184_s5, 256  ;;  %s1358_s19 = smov [#allocation7]  }
  0x3b   : > { %p1285_p3 = scmp.ne.s32.totalorder %s184_s5, %s1284_s22  ;;  %s1289_s23 = sshll.u32 %s1358_s19, 4  ;;  %s1290_s23 = int_to_ptr.vmem [resolvable:$false] %s1289_s23 }
  0x3c   : > { %s1291_s24 = scalar_lea.vmem %s1290_s23, 512  ;;  %p1292_p7 = scmp.lt.s32.totalorder %s184_s5, %s1290_s23 }
  0x3d   : > { %p1287_p5 = pnand %p1285_p3, %p1241_p11  ;;  %p1293_p4 = scmp.lt.s32.totalorder %s1291_s24, %s1284_s22 }
  0x3f   : > { %p1288_p6 = pneg %p1287_p5  ;;  %p1294_p10 = por %p1293_p4, %p1292_p7 }
  0x41   : > { %p1295_p12 = pnand %p1294_p10, %p1288_p6 }
  0x43   : > { %1298 = shalt.err (!%p1295_p12)
}
  0x44   : > { %1106 = dma.hbm_to_vmem [thread:$0]  (!%p1438_p9), %s1483_s8, 256, %s184_s5, %s169_s27  }
  0x45   : > { %p2298_p8 = scmp.ne.s32.totalorder %s2297_s26, 0 }
  0x47   : > { %192 = sbr.rel (%p2298_p8) target bundleno = 347 (0x15b), region = 28 }
  0x4e   : > { %s194_s25 = sand.u32 1, %s1337_s10   ;;  %p2299_p11 = scmp.ne.s32.totalorder %s2295_s20, 0 }
  0x4f   : > { %s1057_s28 = sshll.u32 %s194_s25, 8  ;;  %s195_s4 = scalar_lea.sflag [#allocation6], %s194_s25 }
  0x50   : > { %s1508_s6 = scalar_lea.vmem [#allocation5], %s1057_s28 }
  0x51   : > { %1324 = dma.done.wait (%p2299_p11), %s195_s4, 4096  }
  0x52   : > { %1326 = vsyncadd (%p2299_p11), %s195_s4, 4294963200  ;;  %s1058_s7 = sshll.u32 %s194_s25, 4  ;;  %s204_s30 = scalar_lea.sflag [#allocation8], %s194_s25 }
  0x53   : > { %s207_s29 = scalar_lea.vmem [#allocation7], %s1058_s7 }
  0x54   : > { %1328 = dma.done.wait (%p2299_p11), %s204_s30, 256  }
  0x55   : > { %1330 = vsyncadd (%p2299_p11), %s204_s30, 4294967040  ;;  %v307_v0 = vld [vmem:[%s207_s29] sm:$0xff]  ;;  %v308_v1 = vld [vmem:[%s207_s29 + $0x8] sm:$0xff]  ;;  %v2274_v18 = vmov 0.0   ;;  %p241_p7 = scmp.lt.s32.totalorder %s1345_s12, 1 }
  0x56   : > { %v1518_v2 = vunpack.c.0.s8 %v307_v0  ;;  %v1520_v3 = vunpack.c.0.s8 %v308_v1  ;;  %v1522_v4 = vunpack.c.1.s8 %v307_v0  ;;  %v1524_v5 = vunpack.c.1.s8 %v308_v1  ;;  %v1539_v10 = vld [vmem:[%s1508_s6] sm:$0xff]  ;;  %v1542_v11 = vld [vmem:[%s1508_s6 + $0x8] sm:$0xff]  ;;  %v1545_v12 = vld [vmem:[%s1508_s6 + $0x10] sm:$0xff] }
  0x57   : > { %v1526_v6 = vunpack.c.2.s8 %v307_v0  ;;  %v1528_v7 = vunpack.c.2.s8 %v308_v1  ;;  %v1530_v8 = vunpack.c.3.s8 %v307_v0  ;;  %v1532_v9 = vunpack.c.3.s8 %v308_v1  ;;  %v1548_v13 = vld [vmem:[%s1508_s6 + $0x18] sm:$0xff]  ;;  %v1555_v14 = vld [vmem:[%s1508_s6 + $0x20] sm:$0xff]  ;;  %v1558_v15 = vld [vmem:[%s1508_s6 + $0x28] sm:$0xff]  ;;  %s2356_s12 = smov (!%p241_p7, %s1345_s12), 1 }
  0x58   : > { %vm509_vm0 = vcmp.eq.s32.totalorder %v1518_v2, 1  ;;  %vm510_vm1 = vcmp.eq.s32.totalorder %v1520_v3, 1  ;;  %vm511_vm2 = vcmp.eq.s32.totalorder %v1522_v4, 1  ;;  %vm512_vm3 = vcmp.eq.s32.totalorder %v1524_v5, 1  ;;  %v1561_v16 = vld [vmem:[%s1508_s6 + $0x40] sm:$0xff]  ;;  %v1564_v17 = vld [vmem:[%s1508_s6 + $0x48] sm:$0xff] }
  0x59   : > { %vm513_vm4 = vcmp.eq.s32.totalorder %v1526_v6, 1  ;;  %vm514_vm5 = vcmp.eq.s32.totalorder %v1528_v7, 1  ;;  %vm515_vm6 = vcmp.eq.s32.totalorder %v1530_v8, 1  ;;  %vm516_vm7 = vcmp.eq.s32.totalorder %v1532_v9, 1  ;;  %v1587_v23 = vld [vmem:[%s1508_s6 + $0x50] sm:$0xff]  ;;  %v1590_v24 = vld [vmem:[%s1508_s6 + $0x58] sm:$0xff] }
  0x5a   : > { %v1569_v19 = vsel %vm509_vm0, 1.0, %v2274_v18  ;;  %v1574_v20 = vsel %vm510_vm1, 1.0, %v2274_v18  ;;  %v1579_v21 = vsel %vm511_vm2, 1.0, %v2274_v18  ;;  %v1584_v22 = vsel %vm512_vm3, 1.0, %v2274_v18  ;;  %v1605_v29 = vld [vmem:[%s1508_s6 + $0x30] sm:$0xff]  ;;  %v1608_v30 = vld [vmem:[%s1508_s6 + $0x60] sm:$0xff] }
  0x5b   : > { %v1593_v25 = vsel %vm513_vm4, 1.0, %v2274_v18  ;;  %v1596_v26 = vsel %vm514_vm5, 1.0, %v2274_v18  ;;  %v1599_v27 = vsel %vm515_vm6, 1.0, %v2274_v18  ;;  %v1602_v28 = vsel %vm516_vm7, 1.0, %v2274_v18  ;;  %v1611_v31 = vld [vmem:[%s1508_s6 + $0x68] sm:$0xff]  ;;  %v1622_v36 = vld [vmem:[%s1508_s6 + $0x70] sm:$0xff] }
  0x5c   : > { %2300 = vst [vmem:[#allocation11_spill] sm:$0xff] %v1599_v27  ;;  %2301 = vst [vmem:[#allocation12_spill] sm:$0xff] %v1602_v28  ;;  %v687_v32 = vadd.f32 %v1579_v21, %v1569_v19  ;;  %v688_v33 = vadd.f32 %v1584_v22, %v1574_v20  ;;  %v695_v34 = vadd.f32 %v1599_v27, %v1593_v25  ;;  %v1625_v37 = vld [vmem:[%s1508_s6 + $0x80] sm:$0xff]  ;;  %v1628_v38 = vld [vmem:[%s1508_s6 + $0x88] sm:$0xff]  ;;  %vm501_vm8 = vcmp.eq.s32.totalorder %v1518_v2, 0  ;;  %s1059_s20 = sshll.u32 %s2356_s12, 2 }
  0x5d   : > { %v696_v35 = vadd.f32 %v1602_v28, %v1596_v26  ;;  %v1631_v39 = vld [vmem:[%s1508_s6 + $0x38] sm:$0xff]  ;;  %v1634_v40 = vld [vmem:[%s1508_s6 + $0x90] sm:$0xff]  ;;  %v1640_v42 = vld [vmem:[%s1508_s6 + $0xa0] sm:$0xff]  ;;  %v317_v43 = vmax.f32 %v1539_v10, %v1561_v16  ;;  %v320_v44 = vmax.f32 %v1542_v11, %v1564_v17  ;;  %v323_v45 = vmax.f32 %v1545_v12, %v1587_v23  ;;  %s2234_s8 = scalar_lea.vmem %s2272_s2, %s1059_s20 }
  0x5e   : > { %v1637_v41 = vld [vmem:[%s1508_s6 + $0x98] sm:$0xff]  ;;  %v326_v46 = vmax.f32 %v1548_v13, %v1590_v24  ;;  %v703_v47 = vadd.f32 %v695_v34, %v687_v32  ;;  %v1654_v50 = vld [vmem:[%s1508_s6 + $0xa8] sm:$0xff]  ;;  %v1657_v51 = vld [vmem:[%s1508_s6 + $0xb0] sm:$0xff]  ;;  %v329_v52 = vmax.f32 %v1555_v14, %v1608_v30  ;;  %v332_v53 = vmax.f32 %v1558_v15, %v1611_v31 }
  0x5f   : > { %v704_v48 = vadd.f32 %v696_v35, %v688_v33  ;;  %v1651_v49 = vld [vmem:[%s1508_s6 + $0x78] sm:$0xff]  ;;  %v1664_v54 = vld [vmem:[%s1508_s6 + $0xc0] sm:$0xff]  ;;  %v1667_v55 = vld [vmem:[%s1508_s6 + $0xc8] sm:$0xff]  ;;  %v318_v57 = vmax.f32 %v317_v43, %v1625_v37  ;;  %v321_v58 = vmax.f32 %v320_v44, %v1628_v38  ;;  %v324_v59 = vmax.f32 %v323_v45, %v1634_v40 }
  0x60   : > { %v1670_v56 = vld [vmem:[%s1508_s6 + $0xd0] sm:$0xff]  ;;  %v327_v60 = vmax.f32 %v326_v46, %v1637_v41  ;;  %v1677_v62 = vld [vmem:[%s1508_s6 + $0xd8] sm:$0xff]  ;;  %v1680_v63 = vld [vmem:[%s1508_s6 + $0xe0] sm:$0xff]  ;;  %v330_v1 = vmax.f32 %v329_v52, %v1640_v42  ;;  %v333_v32 = vmax.f32 %v332_v53, %v1654_v50  ;;  %v335_v33 = vmax.f32 %v1605_v29, %v1622_v36 }
  0x61   : > { %v831_v61 = vadd.f32 %v704_v48, %v703_v47  ;;  %v1683_v0 = vld [vmem:[%s1508_s6 + $0xe8] sm:$0xff]  ;;  %v1690_v34 = vld [vmem:[%s1508_s6 + $0xb8] sm:$0xff]  ;;  %v1693_v35 = vld [vmem:[%s1508_s6 + $0xf0] sm:$0xff]  ;;  %v1696_v43 = vmax.f32 %v318_v57, %v1664_v54  ;;  %v1699_v44 = vmax.f32 %v321_v58, %v1667_v55  ;;  %v1702_v45 = vmax.f32 %v324_v59, %v1670_v56 }
  0x62   : > { %v1705_v46 = vmax.f32 %v327_v60, %v1677_v62  ;;  %v1708_v47 = vmax.f32 %v330_v1, %v1680_v63  ;;  %v1711_v48 = vmax.f32 %v333_v32, %v1683_v0  ;;  %v336_v52 = vmax.f32 %v335_v33, %v1657_v51  ;;  %v1717_v57 = vld [vmem:[%s1508_s6 + $0xf8] sm:$0xff] }
  0x63   : > { %832 = vadd.xlane.f32.xlu1 %v831_v61  ;;  %v338_v53 = vmax.f32 %v1631_v39, %v1651_v49  ;;  %v341_v60 = vsub.f32 %v1539_v10, %v1696_v43  ;;  %v342_v61 = vsub.f32 %v1542_v11, %v1699_v44  ;;  %v343_v1 = vsub.f32 %v1545_v12, %v1702_v45 }
  0x64   : > { %v1720_v58 = vmax.f32 %v336_v52, %v1693_v35  ;;  %v344_v32 = vsub.f32 %v1548_v13, %v1705_v46  ;;  %v345_v33 = vsub.f32 %v1555_v14, %v1708_v47  ;;  %v349_v10 = vsub.f32 %v1561_v16, %v1696_v43 }
  0x65   : > { %v339_v59 = vmax.f32 %v338_v53, %v1690_v34  ;;  %v346_v53 = vsub.f32 %v1558_v15, %v1711_v48  ;;  %v350_v11 = vsub.f32 %v1564_v17, %v1699_v44  ;;  %v351_v13 = vsub.f32 %v1587_v23, %v1702_v45 }
  0x66   : > { %v347_v12 = vsub.f32 %v1605_v29, %v1720_v58  ;;  %v352_v14 = vsub.f32 %v1590_v24, %v1705_v46  ;;  %v354_v15 = vsub.f32 %v1611_v31, %v1711_v48  ;;  %v355_v16 = vsub.f32 %v1622_v36, %v1720_v58 }
  0x67   : > { %v1734_v52 = vmax.f32 %v339_v59, %v1717_v57  ;;  %v353_v59 = vsub.f32 %v1608_v30, %v1708_v47  ;;  %v357_v17 = vsub.f32 %v1625_v37, %v1696_v43  ;;  %v358_v29 = vsub.f32 %v1628_v38, %v1699_v44 }
  0x68   : > { %v359_v30 = vsub.f32 %v1634_v40, %v1702_v45  ;;  %v360_v31 = vsub.f32 %v1637_v41, %v1705_v46  ;;  %v361_v36 = vsub.f32 %v1640_v42, %v1708_v47  ;;  %v362_v37 = vsub.f32 %v1654_v50, %v1711_v48 }
  0x69   : > { %v348_v23 = vsub.f32 %v1631_v39, %v1734_v52  ;;  %v356_v24 = vsub.f32 %v1651_v49, %v1734_v52  ;;  %v363_v38 = vsub.f32 %v1657_v51, %v1720_v58  ;;  %v364_v39 = vsub.f32 %v1690_v34, %v1734_v52 }
  0x6a   : > { %v365_v49 = vsub.f32 %v1664_v54, %v1696_v43  ;;  %v366_v40 = vsub.f32 %v1667_v55, %v1699_v44  ;;  %v367_v41 = vsub.f32 %v1670_v56, %v1702_v45  ;;  %v373_v18 = vmul.f32 1.442695, %v341_v60 }
  0x6b   : > { %v368_v42 = vsub.f32 %v1677_v62, %v1705_v46  ;;  %v375_v50 = vmul.f32 1.442695, %v342_v61  ;;  %v377_v28 = vmul.f32 1.442695, %v343_v1  ;;  %v379_v27 = vmul.f32 1.442695, %v344_v32 }
  0x6c   : > { %v369_v51 = vsub.f32 %v1680_v63, %v1708_v47  ;;  %1159 = vpow2.f32 %v373_v18  ;;  %v381_v54 = vmul.f32 1.442695, %v345_v33  ;;  %v383_v43 = vmul.f32 1.442695, %v346_v53 }
  0x6d   : > { %1161 = vpow2.f32 %v375_v50  ;;  %v385_v62 = vmul.f32 1.442695, %v347_v12  ;;  %v387_v44 = vmul.f32 1.442695, %v348_v23  ;;  %v389_v45 = vmul.f32 1.442695, %v349_v10 }
  0x6e   : > { %1163 = vpow2.f32 %v377_v28  ;;  %v391_v46 = vmul.f32 1.442695, %v350_v11  ;;  %v393_v60 = vmul.f32 1.442695, %v351_v13  ;;  %v395_v61 = vmul.f32 1.442695, %v352_v14 }
  0x6f   : > { %1165 = vpow2.f32 %v379_v27  ;;  %v397_v1 = vmul.f32 1.442695, %v353_v59  ;;  %v399_v18 = vmul.f32 1.442695, %v354_v15  ;;  %v401_v32 = vmul.f32 1.442695, %v355_v16 }
  0x70   : > { %1167 = vpow2.f32 %v381_v54  ;;  %v403_v33 = vmul.f32 1.442695, %v356_v24  ;;  %v405_v55 = vmul.f32 1.442695, %v357_v17  ;;  %v407_v34 = vmul.f32 1.442695, %v358_v29 }
  0x71   : > { %1169 = vpow2.f32 %v383_v43  ;;  %v409_v56 = vmul.f32 1.442695, %v359_v30  ;;  %v411_v50 = vmul.f32 1.442695, %v360_v31  ;;  %v1790_v53 = vmul.f32 1.442695, %v361_v36 }
  0x72   : > { %1171 = vpow2.f32 %v385_v62  ;;  %v1792_v28 = vmul.f32 1.442695, %v362_v37  ;;  %v1794_v27 = vmul.f32 1.442695, %v363_v38  ;;  %v1796_v10 = vmul.f32 1.442695, %v364_v39 }
  0x73   : > { %1173 = vpow2.f32 %v387_v44  ;;  %v1798_v11 = vmul.f32 1.442695, %v365_v49  ;;  %v1800_v12 = vmul.f32 1.442695, %v366_v40  ;;  %v1802_v13 = vmul.f32 1.442695, %v367_v41 }
  0x74   : > { %1175 = vpow2.f32 %v389_v45  ;;  %v1804_v14 = vmul.f32 1.442695, %v368_v42  ;;  %vm502_vm9 = vcmp.eq.s32.totalorder %v1520_v3, 0  ;;  %vm503_vm10 = vcmp.eq.s32.totalorder %v1522_v4, 0 }
  0x75   : > { %1177 = vpow2.f32 %v391_v46  ;;  %vm504_vm11 = vcmp.eq.s32.totalorder %v1524_v5, 0  ;;  %vm505_vm12 = vcmp.eq.s32.totalorder %v1526_v6, 0  ;;  %vm506_vm13 = vcmp.eq.s32.totalorder %v1528_v7, 0 }
  0x76   : > { %v1808_v59 = vpop.eup %1159  ;;  %1179 = vpow2.f32 %v393_v60  ;;  %vm507_vm14 = vcmp.eq.s32.totalorder %v1530_v8, 0  ;;  %vm508_vm15 = vcmp.eq.s32.totalorder %v1532_v9, 0  ;;  %v2302_v17 = vmov 0.0  }
  0x77   : > { %v1813_v15 = vpop.eup %1161  ;;  %1181 = vpow2.f32 %v395_v61  ;;  %v1821_v29 = vsel %vm501_vm8, 1.0, %v2302_v17  ;;  %v1824_v23 = vsel %vm502_vm9, 1.0, %v2302_v17  ;;  %v1827_v24 = vsel %vm503_vm10, 1.0, %v2302_v17 }
  0x78   : > { %v1818_v16 = vpop.eup %1163  ;;  %1183 = vpow2.f32 %v397_v1  ;;  %v1832_v31 = vsel %vm504_vm11, 1.0, %v2302_v17  ;;  %v1835_v36 = vsel %vm505_vm12, 1.0, %v2302_v17  ;;  %v1838_v37 = vsel %vm506_vm13, 1.0, %v2302_v17 }
  0x79   : > { %v1829_v30 = vpop.eup %1165  ;;  %1185 = vpow2.f32 %v399_v18  ;;  %v1843_v39 = vsel %vm507_vm14, 1.0, %v2302_v17  ;;  %v1846_v49 = vsel %vm508_vm15, 1.0, %v2302_v17  ;;  %v685_v40 = vadd.f32 %v1827_v24, %v1821_v29 }
  0x7a   : > { %v1840_v38 = vpop.eup %1167  ;;  %1187 = vpow2.f32 %v401_v32  ;;  %v686_v42 = vadd.f32 %v1832_v31, %v1824_v23  ;;  %v693_v54 = vadd.f32 %v1843_v39, %v1835_v36  ;;  %v694_v43 = vadd.f32 %v1846_v49, %v1838_v37 }
  0x7b   : > { %v1850_v41 = vpop.eup %1169  ;;  %1189 = vpow2.f32 %v403_v33  ;;  %v429_v44 = vmul.f32 1.442695, %v369_v51  ;;  %v2303_v45 = vsub.f32 %v1683_v0, %v1711_v48  ;;  %v2304_v60 = vsub.f32 %v1693_v35, %v1720_v58 }
  0x7c   : > { %v1858_v62 = vpop.eup %1171  ;;  %1191 = vpow2.f32 %v405_v55  ;;  %v701_v18 = vadd.f32 %v693_v54, %v685_v40  ;;  %v702_v32 = vadd.f32 %v694_v43, %v686_v42  ;;  %vm525_vm0 = vcmp.eq.s32.totalorder %v1518_v2, 3 }
  0x7d   : > { %v1866_v46 = vmul.f32 1.442695, %v2303_v45  ;;  %v1871_v61 = vmul.f32 1.442695, %v2304_v60  ;;  %v1873_v1 = vpop.eup %1173  ;;  %1193 = vpow2.f32 %v407_v34  ;;  %vm526_vm1 = vcmp.eq.s32.totalorder %v1520_v3, 3 }
  0x7e   : > { %v1876_v55 = vpop.eup %1175  ;;  %1195 = vpow2.f32 %v409_v56  ;;  %vm527_vm2 = vcmp.eq.s32.totalorder %v1522_v4, 3  ;;  %vm528_vm3 = vcmp.eq.s32.totalorder %v1524_v5, 3  ;;  %v828_v0 = vadd.f32 %v702_v32, %v701_v18 }
  0x7f   : > { %v1881_v63 = vpop.eup %1177  ;;  %1197 = vpow2.f32 %v411_v50  ;;  %vm529_vm4 = vcmp.eq.s32.totalorder %v1526_v6, 3  ;;  %vm530_vm5 = vcmp.eq.s32.totalorder %v1528_v7, 3  ;;  %vm531_vm6 = vcmp.eq.s32.totalorder %v1530_v8, 3 }
  0x80   : > { %v1885_v35 = vpop.eup %1179  ;;  %1199 = vpow2.f32 %v1790_v53  ;;  %vm532_vm7 = vcmp.eq.s32.totalorder %v1532_v9, 3  ;;  %v1891_v47 = vsel %vm525_vm0, 1.0, %v2302_v17  ;;  %829 = vadd.xlane.f32.xlu0 %v828_v0  ;;  %v1899_v58 = vsel %vm526_vm1, 1.0, %v2302_v17 }
  0x81   : > { %2305 = vst [vmem:[#allocation13_spill] sm:$0xff] %v1891_v47  ;;  %v1893_v48 = vpop.eup %1181  ;;  %1201 = vpow2.f32 %v1792_v28  ;;  %2306 = vst [vmem:[#allocation14_spill] sm:$0xff] %v1899_v58  ;;  %v1904_v51 = vsel %vm527_vm2, 1.0, %v2302_v17  ;;  %v1909_v34 = vsel %vm528_vm3, 1.0, %v2302_v17  ;;  %v2309_v33 = vsub.f32 %v1717_v57, %v1734_v52 }
  0x82   : > { %2307 = vst [vmem:[#allocation15_spill] sm:$0xff] %v1904_v51  ;;  %2308 = vst [vmem:[#allocation16_spill] sm:$0xff] %v1909_v34  ;;  %v1911_v56 = vpop.eup %1183  ;;  %1203 = vpow2.f32 %v1794_v27  ;;  %v1920_v53 = vsel %vm529_vm4, 1.0, %v2302_v17  ;;  %v1925_v28 = vsel %vm530_vm5, 1.0, %v2302_v17  ;;  %v437_v27 = vadd.f32 %v1876_v55, %v1808_v59 }
  0x83   : > { %v435_v50 = vmul.f32 1.442695, %v2309_v33  ;;  %2310 = vst [vmem:[#allocation17_spill] sm:$0xff] %v1920_v53  ;;  %2311 = vst [vmem:[#allocation18_spill] sm:$0xff] %v1925_v28  ;;  %v1927_v40 = vpop.eup %1185  ;;  %1205 = vpow2.f32 %v1796_v10  ;;  %v1935_v57 = vsel %vm531_vm6, 1.0, %v2302_v17  ;;  %v1940_v52 = vsel %vm532_vm7, 1.0, %v2302_v17 }
  0x84   : > { %2312 = vst [vmem:[#allocation19_spill] sm:$0xff] %v1935_v57  ;;  %2313 = vst [vmem:[#allocation20_spill] sm:$0xff] %v1940_v52  ;;  %v1942_v42 = vpop.eup %1187  ;;  %1207 = vpow2.f32 %v1798_v11  ;;  %v440_v10 = vadd.f32 %v1881_v63, %v1813_v15  ;;  %v691_v54 = vadd.f32 %v1904_v51, %v1891_v47  ;;  %v692_v43 = vadd.f32 %v1909_v34, %v1899_v58 }
  0x85   : > { %v1951_v45 = vpop.eup %1189  ;;  %1209 = vpow2.f32 %v1800_v12  ;;  %v443_v60 = vadd.f32 %v1885_v35, %v1818_v16  ;;  %v699_v18 = vadd.f32 %v1935_v57, %v1920_v53  ;;  %v700_v11 = vadd.f32 %v1940_v52, %v1925_v28 }
  0x86   : > { %v1960_v32 = vpop.eup %1191  ;;  %1211 = vpow2.f32 %v1802_v13  ;;  %v446_v0 = vadd.f32 %v1893_v48, %v1829_v30  ;;  %v449_v33 = vadd.f32 %v1911_v56, %v1840_v38  ;;  %v452_v12 = vadd.f32 %v1927_v40, %v1850_v41 }
  0x87   : > { %v1969_v34 = vpop.eup %1193  ;;  %1213 = vpow2.f32 %v1804_v14  ;;  %v455_v52 = vadd.f32 %v1942_v42, %v1858_v62  ;;  %v707_v57 = vadd.f32 %v699_v18, %v691_v54  ;;  %v708_v28 = vadd.f32 %v700_v11, %v692_v43 }
  0x88   : > { %v1974_v53 = vpop.eup %1195  ;;  %1215 = vpow2.f32 %v429_v44  ;;  %v458_v13 = vadd.f32 %v1951_v45, %v1873_v1  ;;  %vm517_vm8 = vcmp.eq.s32.totalorder %v1518_v2, 2  ;;  %vm518_vm9 = vcmp.eq.s32.totalorder %v1520_v3, 2 }
  0x89   : > { %v1980_v51 = vpop.eup %1197  ;;  %1217 = vpow2.f32 %v1866_v46  ;;  %v837_v14 = vadd.f32 %v708_v28, %v707_v57  ;;  %vm519_vm10 = vcmp.eq.s32.totalorder %v1522_v4, 2  ;;  %vm520_vm11 = vcmp.eq.s32.totalorder %v1524_v5, 2 }
  0x8a   : > { %2314 = vst [vmem:[#allocation21_spill] sm:$0xff] %v1980_v51  ;;  %v1985_v54 = vpop.eup %1199  ;;  %1219 = vpow2.f32 %v1871_v61  ;;  %vm521_vm12 = vcmp.eq.s32.totalorder %v1526_v6, 2  ;;  %vm522_vm13 = vcmp.eq.s32.totalorder %v1528_v7, 2  ;;  %vm523_vm14 = vcmp.eq.s32.totalorder %v1530_v8, 2 }
  0x8b   : > { %v1991_v44 = vpop.eup %1201  ;;  %1221 = vpow2.f32 %v435_v50  ;;  %v438_v46 = vadd.f32 %v1960_v32, %v437_v27  ;;  %838 = vadd.xlane.f32.xlu1 %v837_v14  ;;  %vm524_vm15 = vcmp.eq.s32.totalorder %v1532_v9, 2  ;;  %v1998_v28 = vsel %vm517_vm8, 1.0, %v2302_v17 }
  0x8c   : > { %2315 = vst [vmem:[#allocation22_spill] sm:$0xff] %v1998_v28  ;;  %v2000_v61 = vpop.eup %1203  ;;  %v441_v57 = vadd.f32 %v1969_v34, %v440_v10  ;;  %v2006_v43 = vsel %vm518_vm9, 1.0, %v2302_v17  ;;  %v2011_v50 = vsel %vm519_vm10, 1.0, %v2302_v17  ;;  %v2016_v2 = vsel %vm520_vm11, 1.0, %v2302_v17 }
  0x8d   : > { %2316 = vst [vmem:[#allocation23_spill] sm:$0xff] %v2006_v43  ;;  %2317 = vst [vmem:[#allocation24_spill] sm:$0xff] %v2011_v50  ;;  %v2018_v9 = vpop.eup %1205  ;;  %v444_v27 = vadd.f32 %v1974_v53, %v443_v60  ;;  %v2024_v3 = vsel %vm521_vm12, 1.0, %v2302_v17  ;;  %v2029_v4 = vsel %vm522_vm13, 1.0, %v2302_v17  ;;  %v2034_v5 = vsel %vm523_vm14, 1.0, %v2302_v17 }
  0x8e   : > { %2318 = vst [vmem:[#allocation25_spill] sm:$0xff] %v2016_v2  ;;  %2319 = vst [vmem:[#allocation26_spill] sm:$0xff] %v2029_v4  ;;  %v1208_v10 = vpop.eup %1207  ;;  %v447_v18 = vadd.f32 %v1980_v51, %v446_v0  ;;  %v2038_v60 = vsel %vm524_vm15, 1.0, %v2302_v17  ;;  %v689_v6 = vadd.f32 %v2011_v50, %v1998_v28  ;;  %v690_v11 = vadd.f32 %v2016_v2, %v2006_v43 }
  0x8f   : > { %2320 = vst [vmem:[#allocation27_spill] sm:$0xff] %v2034_v5  ;;  %2321 = vst [vmem:[#allocation28_spill] sm:$0xff] %v2038_v60  ;;  %v1210_v7 = vpop.eup %1209  ;;  %v439_v14 = vadd.f32 %v1208_v10, %v438_v46  ;;  %v450_v58 = vadd.f32 %v1985_v54, %v449_v33  ;;  %v697_v8 = vadd.f32 %v2034_v5, %v2024_v3  ;;  %vm908_vm0 = vcmask 7168  }
  0x90   : > { %v698_v47 = vadd.f32 %v2038_v60, %v2029_v4  ;;  %v2049_v0 = vpop.eup %1211  ;;  %v442_v17 = vadd.f32 %v1210_v7, %v441_v57  ;;  %v453_v51 = vadd.f32 %v1991_v44, %v452_v12  ;;  %v456_v50 = vadd.f32 %v2000_v61, %v455_v52 }
  0x91   : > { %v2053_v28 = vpop.eup %1213  ;;  %v445_v2 = vadd.f32 %v2049_v0, %v444_v27  ;;  %1223 = vrcp.f32 %v439_v14  ;;  %v705_v46 = vadd.f32 %v697_v8, %v689_v6  ;;  %v459_v60 = vadd.f32 %v2018_v9, %v458_v13 }
  0x92   : > { %v706_v33 = vadd.f32 %v698_v47, %v690_v11  ;;  %v2056_v43 = vpop.eup %1215  ;;  %v448_v5 = vadd.f32 %v2053_v28, %v447_v18  ;;  %1225 = vrcp.f32 %v442_v17  ;;  %vm913_vm1 = vcmask 15360  }
  0x93   : > { %v2060_v4 = vpop.eup %1217  ;;  %v451_v12 = vadd.f32 %v2056_v43, %v450_v58  ;;  %1227 = vrcp.f32 %v445_v2  ;;  %vm918_vm2 = vcmask 16384  }
  0x94   : > { %v834_v52 = vadd.f32 %v706_v33, %v705_v46  ;;  %v2063_v57 = vpop.eup %1219  ;;  %v454_v27 = vadd.f32 %v2060_v4, %v453_v51  ;;  %1229 = vrcp.f32 %v448_v5 }
  0x95   : > { %v2066_v6 = vpop.eup %1221  ;;  %v457_v47 = vadd.f32 %v2063_v57, %v456_v50  ;;  %1231 = vrcp.f32 %v451_v12 }
  0x96   : > { %835 = vadd.xlane.f32.xlu0 %v834_v52  ;;  %v460_v13 = vadd.f32 %v2066_v6, %v459_v60  ;;  %1233 = vrcp.f32 %v454_v27 }
  0x97   : > { %1235 = vrcp.f32 %v457_v47  ;;  %v2326_v47 = vld [vmem:[#allocation11_spill] sm:$0xff] }
  0x98   : > { %1237 = vrcp.f32 %v460_v13 }
  0x9b   : > { %v1224_v18 = vpop.eup %1223 }
  0x9c   : > { %v1226_v58 = vpop.eup %1225  ;;  %v477_v2 = vmul.f32 %v1224_v18, %v1876_v55  ;;  %v469_v11 = vmul.f32 %v1224_v18, %v1808_v59  ;;  %v2073_v51 = vmul.f32 %v1224_v18, %v1960_v32  ;;  %v2075_v5 = vmul.f32 %v1224_v18, %v1208_v10 }
  0x9d   : > { %v2077_v14 = vpop.eup %1227  ;;  %v478_v50 = vmul.f32 %v1226_v58, %v1881_v63  ;;  %v470_v60 = vmul.f32 %v1226_v58, %v1813_v15  ;;  %v2082_v8 = vmul.f32 %v1226_v58, %v1969_v34  ;;  %v2084_v17 = vmul.f32 %v1226_v58, %v1210_v7  ;;  %v2327_v58 = vld [vmem:[#allocation12_spill] sm:$0xff] }
  0x9e   : > { %v2086_v46 = vpop.eup %1229  ;;  %v479_v59 = vmul.f32 %v2077_v14, %v1885_v35  ;;  %v2091_v55 = vmul.f32 %v1569_v19, %v477_v2  ;;  %v471_v32 = vmul.f32 %v2077_v14, %v1818_v16  ;;  %v605_v63 = vmul.f32 %v1821_v29, %v469_v11 }
  0x9f   : > { %v2096_v10 = vpop.eup %1231  ;;  %v480_v15 = vmul.f32 %v2086_v46, %v1893_v48  ;;  %v2101_v34 = vmul.f32 %v1574_v20, %v478_v50  ;;  %v472_v7 = vmul.f32 %v2086_v46, %v1829_v30  ;;  %v606_v35 = vmul.f32 %v1824_v23, %v470_v60 }
  0xa0   : > { %v2106_v19 = vpop.eup %1233  ;;  %v481_v16 = vmul.f32 %v2096_v10, %v1911_v56  ;;  %v2111_v29 = vmul.f32 %v1579_v21, %v479_v59  ;;  %v473_v33 = vmul.f32 %v2096_v10, %v1840_v38  ;;  %v607_v48 = vmul.f32 %v1827_v24, %v471_v32 }
  0xa1   : > { %2322 = vst [vmem:[#allocation29_spill] sm:$0xff] %v2101_v34  ;;  %v2116_v20 = vpop.eup %1235  ;;  %v482_v30 = vmul.f32 %v2106_v19, %v1927_v40  ;;  %v2121_v23 = vmul.f32 %v1584_v22, %v480_v15  ;;  %v474_v12 = vmul.f32 %v2106_v19, %v1850_v41  ;;  %v608_v56 = vmul.f32 %v1832_v31, %v472_v7 }
  0xa2   : > { %v1238_v21 = vpop.eup %1237  ;;  %v483_v52 = vmul.f32 %v2116_v20, %v1942_v42  ;;  %v2129_v38 = vmul.f32 %v1593_v25, %v481_v16  ;;  %v475_v24 = vmul.f32 %v2116_v20, %v1858_v62  ;;  %v609_v40 = vmul.f32 %v1835_v36, %v473_v33 }
  0xa3   : > { %2323 = vst [vmem:[#allocation30_spill] sm:$0xff] %v2121_v23  ;;  %v484_v22 = vmul.f32 %v1238_v21, %v1951_v45  ;;  %v2136_v27 = vmul.f32 %v1596_v26, %v482_v30  ;;  %v476_v41 = vmul.f32 %v1238_v21, %v1873_v1  ;;  %v610_v31 = vmul.f32 %v1838_v37, %v474_v12 }
  0xa4   : > { %2324 = vst [vmem:[#allocation31_spill] sm:$0xff] %v2129_v38  ;;  %v2141_v13 = vmul.f32 %v2326_v47, %v483_v52  ;;  %v611_v25 = vmul.f32 %v1843_v39, %v475_v24  ;;  %v735_v42 = vadd.f32 %v479_v59, %v477_v2  ;;  %v736_v18 = vadd.f32 %v480_v15, %v478_v50  ;;  %v2328_v39 = vld [vmem:[#allocation21_spill] sm:$0xff]  ;;  %v2329_v15 = vld [vmem:[#allocation22_spill] sm:$0xff] }
  0xa5   : > { %2325 = vst [vmem:[#allocation32_spill] sm:$0xff] %v2136_v27  ;;  %v2145_v62 = vmul.f32 %v2327_v58, %v484_v22  ;;  %v612_v36 = vmul.f32 %v1846_v49, %v476_v41  ;;  %v743_v45 = vadd.f32 %v483_v52, %v481_v16  ;;  %v744_v38 = vadd.f32 %v484_v22, %v482_v30  ;;  %v2331_v30 = vld [vmem:[#allocation24_spill] sm:$0xff]  ;;  %v2334_v52 = vld [vmem:[#allocation27_spill] sm:$0xff] }
  0xa6   : > { %v733_v26 = vadd.f32 %v471_v32, %v469_v11  ;;  %v734_v27 = vadd.f32 %v472_v7, %v470_v60  ;;  %v741_v23 = vadd.f32 %v475_v24, %v473_v33  ;;  %v742_v1 = vadd.f32 %v476_v41, %v474_v12  ;;  %v2330_v33 = vld [vmem:[#allocation23_spill] sm:$0xff]  ;;  %v2335_v24 = vld [vmem:[#allocation28_spill] sm:$0xff] }
  0xa7   : > { %v751_v34 = vadd.f32 %v743_v45, %v735_v42  ;;  %v752_v37 = vadd.f32 %v744_v38, %v736_v18  ;;  %v2150_v47 = vmul.f32 %v2077_v14, %v1974_v53  ;;  %v2154_v2 = vmul.f32 %v2086_v46, %v2328_v39 }
  0xa8   : > { %v749_v50 = vadd.f32 %v741_v23, %v733_v26  ;;  %v750_v59 = vadd.f32 %v742_v1, %v734_v27  ;;  %v2158_v49 = vmul.f32 %v2096_v10, %v1985_v54  ;;  %v2162_v11 = vmul.f32 %v2106_v19, %v1991_v44  ;;  %v2332_v44 = vld [vmem:[#allocation25_spill] sm:$0xff] }
  0xa9   : > { %v875_v60 = vadd.f32 %v752_v37, %v751_v34  ;;  %v2166_v32 = vmul.f32 %v2116_v20, %v2000_v61  ;;  %v2169_v53 = vmul.f32 %v1238_v21, %v2018_v9  ;;  %v621_v7 = vmul.f32 %v2329_v15, %v2073_v51  ;;  %v2333_v9 = vld [vmem:[#allocation26_spill] sm:$0xff] }
  0xaa   : > { %v872_v16 = vadd.f32 %v750_v59, %v749_v50  ;;  %v622_v54 = vmul.f32 %v2330_v33, %v2082_v8  ;;  %v623_v23 = vmul.f32 %v2331_v30, %v2150_v47  ;;  %v624_v34 = vmul.f32 %v2332_v44, %v2154_v2  ;;  %v2341_v15 = vld [vmem:[#allocation18_spill] sm:$0xff]  ;;  %v2344_v44 = vld [vmem:[#allocation29_spill] sm:$0xff] }
  0xab   : > { %876 = vadd.xlane.f32.xlu1 %v875_v60  ;;  %v625_v61 = vmul.f32 %v2024_v3, %v2158_v49  ;;  %v626_v12 = vmul.f32 %v2333_v9, %v2162_v11  ;;  %v627_v38 = vmul.f32 %v2334_v52, %v2166_v32  ;;  %v628_v22 = vmul.f32 %v2335_v24, %v2169_v53  ;;  %v2346_v9 = vld [vmem:[#allocation31_spill] sm:$0xff] }
  0xac   : > { %873 = vadd.xlane.f32.xlu0 %v872_v16  ;;  %v641_v27 = vadd.f32 %v623_v23, %v621_v7  ;;  %v642_v41 = vadd.f32 %v624_v34, %v622_v54  ;;  %v637_v42 = vadd.f32 %v607_v48, %v605_v63  ;;  %v638_v18 = vadd.f32 %v608_v56, %v606_v35  ;;  %v2342_v16 = vld [vmem:[#allocation19_spill] sm:$0xff]  ;;  %v2345_v34 = vld [vmem:[#allocation30_spill] sm:$0xff]  ;;  %v2347_v52 = vld [vmem:[#allocation32_spill] sm:$0xff] }
  0xad   : > { %v649_v58 = vadd.f32 %v627_v38, %v625_v61  ;;  %v650_v45 = vadd.f32 %v628_v22, %v626_v12  ;;  %v645_v26 = vadd.f32 %v611_v25, %v609_v40  ;;  %v646_v1 = vadd.f32 %v612_v36, %v610_v31  ;;  %v2340_v25 = vld [vmem:[#allocation17_spill] sm:$0xff] }
  0xae   : > { %v495_v3 = vmul.f32 %v2077_v14, %v2049_v0  ;;  %v496_v37 = vmul.f32 %v2086_v46, %v2053_v28  ;;  %v497_v39 = vmul.f32 %v2096_v10, %v2056_v43  ;;  %v498_v50 = vmul.f32 %v2106_v19, %v2060_v4  ;;  %v2336_v0 = vld [vmem:[#allocation13_spill] sm:$0xff]  ;;  %v2337_v28 = vld [vmem:[#allocation14_spill] sm:$0xff]  ;;  %v2338_v10 = vld [vmem:[#allocation15_spill] sm:$0xff] }
  0xaf   : > { %v657_v59 = vadd.f32 %v649_v58, %v641_v27  ;;  %v658_v60 = vadd.f32 %v650_v45, %v642_v41  ;;  %v653_v63 = vadd.f32 %v645_v26, %v637_v42  ;;  %v654_v35 = vadd.f32 %v646_v1, %v638_v18  ;;  %v2339_v4 = vld [vmem:[#allocation16_spill] sm:$0xff] }
  0xb0   : > { %v499_v48 = vmul.f32 %v2116_v20, %v2063_v57  ;;  %v500_v56 = vmul.f32 %v1238_v21, %v2066_v6  ;;  %v629_v14 = vmul.f32 %v2336_v0, %v2075_v5  ;;  %v630_v46 = vmul.f32 %v2337_v28, %v2084_v17  ;;  %v2343_v20 = vld [vmem:[#allocation20_spill] sm:$0xff] }
  0xb1   : > { %v790_v40 = vadd.f32 %v658_v60, %v657_v59  ;;  %v784_v43 = vadd.f32 %v654_v35, %v653_v63  ;;  %v631_v31 = vmul.f32 %v2338_v10, %v495_v3  ;;  %v632_v19 = vmul.f32 %v2339_v4, %v496_v37 }
  0xb2   : > { %v633_v36 = vmul.f32 %v2340_v25, %v497_v39  ;;  %v634_v7 = vmul.f32 %v2341_v15, %v498_v50  ;;  %v635_v57 = vmul.f32 %v2342_v16, %v499_v48  ;;  %v636_v6 = vmul.f32 %v2343_v20, %v500_v56 }
  0xb3   : > { %791 = vadd.xlane.f32.xlu1 %v790_v40  ;;  %785 = vadd.xlane.f32.xlu0 %v784_v43  ;;  %v643_v21 = vadd.f32 %v631_v31, %v629_v14  ;;  %v644_v33 = vadd.f32 %v632_v19, %v630_v46  ;;  %v639_v54 = vadd.f32 %v2111_v29, %v2091_v55 }
  0xb4   : > { %v651_v30 = vadd.f32 %v635_v57, %v633_v36  ;;  %v652_v23 = vadd.f32 %v636_v6, %v634_v7  ;;  %v640_v61 = vadd.f32 %v2345_v34, %v2344_v44  ;;  %v647_v12 = vadd.f32 %v2141_v13, %v2346_v9 }
  0xb5   : > { %v648_v38 = vadd.f32 %v2145_v62, %v2347_v52  ;;  %v739_v24 = vadd.f32 %v495_v3, %v2075_v5  ;;  %v740_v22 = vadd.f32 %v496_v37, %v2084_v17  ;;  %v747_v27 = vadd.f32 %v499_v48, %v497_v39 }
  0xb6   : > { %v659_v41 = vadd.f32 %v651_v30, %v643_v21  ;;  %v660_v42 = vadd.f32 %v652_v23, %v644_v33  ;;  %v655_v18 = vadd.f32 %v647_v12, %v639_v54  ;;  %v748_v55 = vadd.f32 %v500_v56, %v498_v50 }
  0xb7   : > { %v656_v29 = vadd.f32 %v648_v38, %v640_v61  ;;  %v755_v58 = vadd.f32 %v747_v27, %v739_v24  ;;  %v737_v45 = vadd.f32 %v2150_v47, %v2073_v51  ;;  %v738_v13 = vadd.f32 %v2154_v2, %v2082_v8 }
  0xb8   : > { %v793_v26 = vadd.f32 %v660_v42, %v659_v41  ;;  %v756_v1 = vadd.f32 %v748_v55, %v740_v22  ;;  %v745_v5 = vadd.f32 %v2166_v32, %v2158_v49  ;;  %v746_v17 = vadd.f32 %v2169_v53, %v2162_v11 }
  0xb9   : > { %v787_v62 = vadd.f32 %v656_v29, %v655_v18 }
  0xba   : > { %794 = vadd.xlane.f32.xlu1 %v793_v26  ;;  %v881_v3 = vadd.f32 %v756_v1, %v755_v58  ;;  %v753_v37 = vadd.f32 %v745_v5, %v737_v45  ;;  %v754_v39 = vadd.f32 %v746_v17, %v738_v13 }
  0xbb   : > { %788 = vadd.xlane.f32.xlu0 %v787_v62 }
  0xbc   : > { %v878_v50 = vadd.f32 %v754_v39, %v753_v37 }
  0xbe   : > { %882 = vadd.xlane.f32.xlu1 %v881_v3 }
  0xbf   : > { %879 = vadd.xlane.f32.xlu0 %v878_v50 }
  0xf0   : > { %v833_v47 = vpop.xlane.xlu1 %832 }
  0xf1   : > { %v846_v53 = vrot.slane %v833_v47, 4 }
  0xf3   : > { %v847_v43 = vadd.f32 %v846_v53, %v833_v47 }
  0xf5   : > { %v848_v16 = vrot.slane %v847_v43, 2 }
  0xf7   : > { %v849_v12 = vadd.f32 %v848_v16, %v847_v43 }
  0xf9   : > { %v850_v39 = vrot.slane %v849_v12, 1 }
  0xfb   : > { %v851_v53 = vadd.f32 %v850_v39, %v849_v12 }
 0x10d   : > { %v830_v51 = vpop.xlane.xlu0 %829 }
 0x10e   : > { %v840_v59 = vrot.slane %v830_v51, 4 }
 0x110   : > { %v841_v63 = vadd.f32 %v840_v59, %v830_v51 }
 0x112   : > { %v842_v35 = vrot.slane %v841_v63, 2 }
 0x114   : > { %v843_v31 = vadd.f32 %v842_v35, %v841_v63 }
 0x116   : > { %v844_v20 = vrot.slane %v843_v31, 1 }
 0x118   : > { %v839_v2 = vpop.xlane.xlu1 %838  ;;  %v845_v24 = vadd.f32 %v844_v20, %v843_v31 }
 0x119   : > { %v858_v28 = vrot.slane %v839_v2, 4 }
 0x11b   : > { %v859_v15 = vadd.f32 %v858_v28, %v839_v2 }
 0x11d   : > { %v860_v34 = vrot.slane %v859_v15, 2 }
 0x11f   : > { %v861_v13 = vadd.f32 %v860_v34, %v859_v15 }
 0x123   : > { %v836_v8 = vpop.xlane.xlu0 %835 }
 0x124   : > { %v852_v10 = vrot.slane %v836_v8, 4 }
 0x126   : > { %v853_v57 = vadd.f32 %v852_v10, %v836_v8 }
 0x128   : > { %v854_v52 = vrot.slane %v853_v57, 2 }
 0x12a   : > { %v855_v17 = vadd.f32 %v854_v52, %v853_v57 }
 0x12c   : > { %v856_v63 = vrot.slane %v855_v17, 1 }
 0x12e   : > { %v857_v10 = vadd.f32 %v856_v63, %v855_v17 }
 0x138   : > { %v877_v49 = vpop.xlane.xlu1 %876 }
 0x139   : > { %v874_v60 = vpop.xlane.xlu0 %873  ;;  %v890_v48 = vrot.slane %v877_v49, 4 }
 0x13a   : > { %v884_v32 = vrot.slane %v874_v60, 4 }
 0x13b   : > { %v891_v4 = vadd.f32 %v890_v48, %v877_v49 }
 0x13c   : > { %v885_v11 = vadd.f32 %v884_v32, %v874_v60  ;;  %v862_v60 = vrot.slane %v861_v13, 1 }
 0x13d   : > { %v892_v6 = vrot.slane %v891_v4, 2 }
 0x13e   : > { %v886_v56 = vrot.slane %v885_v11, 2 }
 0x13f   : > { %v893_v22 = vadd.f32 %v892_v6, %v891_v4 }
 0x140   : > { %v792_v0 = vpop.xlane.xlu1 %791  ;;  %v786_v14 = vpop.xlane.xlu0 %785  ;;  %v887_v25 = vadd.f32 %v886_v56, %v885_v11 }
 0x141   : > { %v808_v46 = vrot.slane %v792_v0, 4  ;;  %v796_v40 = vrot.slane %v786_v14, 4  ;;  %v894_v47 = vrot.slane %v893_v22, 1 }
 0x142   : > { %v888_v54 = vrot.slane %v887_v25, 1 }
 0x143   : > { %v797_v19 = vadd.f32 %v796_v40, %v786_v14  ;;  %v809_v36 = vadd.f32 %v808_v46, %v792_v0  ;;  %v895_v0 = vadd.f32 %v894_v47, %v893_v22  ;;  %v863_v46 = vadd.f32 %v862_v60, %v861_v13 }
 0x144   : > { %v889_v18 = vadd.f32 %v888_v54, %v887_v25 }
 0x145   : > { %v798_v7 = vrot.slane %v797_v19, 2  ;;  %v810_v30 = vrot.slane %v809_v36, 2 }
 0x147   : > { %v799_v21 = vadd.f32 %v798_v7, %v797_v19  ;;  %v795_v33 = vpop.xlane.xlu1 %794  ;;  %v811_v55 = vadd.f32 %v810_v30, %v809_v36 }
 0x148   : > { %v814_v23 = vrot.slane %v795_v33, 4  ;;  %v789_v44 = vpop.xlane.xlu0 %788 }
 0x149   : > { %v800_v61 = vrot.slane %v799_v21, 1  ;;  %v802_v9 = vrot.slane %v789_v44, 4  ;;  %v812_v8 = vrot.slane %v811_v55, 1 }
 0x14a   : > { %v815_v38 = vadd.f32 %v814_v23, %v795_v33 }
 0x14b   : > { %v801_v27 = vadd.f32 %v800_v61, %v799_v21  ;;  %v803_v41 = vadd.f32 %v802_v9, %v789_v44  ;;  %v883_v42 = vpop.xlane.xlu1 %882  ;;  %v813_v14 = vadd.f32 %v812_v8, %v811_v55 }
 0x14c   : > { %v816_v29 = vrot.slane %v815_v38, 2  ;;  %v902_v58 = vrot.slane %v883_v42, 4  ;;  %v880_v45 = vpop.xlane.xlu0 %879 }
 0x14d   : > { %v909_v26 = vsel %vm908_vm0, %v801_v27, %v845_v24  ;;  %v804_v1 = vrot.slane %v803_v41, 2  ;;  %v896_v5 = vrot.slane %v880_v45, 4  ;;  %v911_v36 = vsel %vm908_vm0, %v813_v14, %v857_v10 }
 0x14e   : > { %v914_v62 = vsel %vm913_vm1, %v909_v26, %v889_v18  ;;  %v817_v3 = vadd.f32 %v816_v29, %v815_v38  ;;  %v903_v37 = vadd.f32 %v902_v58, %v883_v42 }
 0x14f   : > { %919 = vst.msk [vmem:[%s2234_s8] sm:$0x1] %vm918_vm2, %v914_v62  ;;  %v805_v50 = vadd.f32 %v804_v1, %v803_v41  ;;  %v897_v51 = vadd.f32 %v896_v5, %v880_v45 }
 0x150   : > { %v818_v2 = vrot.slane %v817_v3, 1  ;;  %v904_v59 = vrot.slane %v903_v37, 2 }
 0x151   : > { %v806_v49 = vrot.slane %v805_v50, 1  ;;  %v898_v32 = vrot.slane %v897_v51, 2 }
 0x152   : > { %v905_v11 = vadd.f32 %v904_v59, %v903_v37  ;;  %v819_v35 = vadd.f32 %v818_v2, %v817_v3 }
 0x153   : > { %v807_v48 = vadd.f32 %v806_v49, %v805_v50  ;;  %v899_v56 = vadd.f32 %v898_v32, %v897_v51 }
 0x154   : > { %v906_v28 = vrot.slane %v905_v11, 1  ;;  %v912_v19 = vsel %vm908_vm0, %v819_v35, %v863_v46 }
 0x155   : > { %v910_v40 = vsel %vm908_vm0, %v807_v48, %v851_v53  ;;  %v900_v43 = vrot.slane %v899_v56, 1 }
 0x156   : > { %v915_v31 = vsel %vm913_vm1, %v910_v40, %v895_v0  ;;  %v907_v4 = vadd.f32 %v906_v28, %v905_v11 }
 0x157   : > { %920 = vst.msk [vmem:[%s2234_s8 + $0x1] sm:$0x1] %vm918_vm2, %v915_v31  ;;  %v901_v25 = vadd.f32 %v900_v43, %v899_v56 }
 0x158   : > { %v917_v15 = vsel %vm913_vm1, %v912_v19, %v907_v4 }
 0x159   : > { %922 = vst.msk [vmem:[%s2234_s8 + $0x3] sm:$0x1] %vm918_vm2, %v917_v15  ;;  %v916_v7 = vsel %vm913_vm1, %v911_v36, %v901_v25 }
 0x15a   : > { %921 = vst.msk [vmem:[%s2234_s8 + $0x2] sm:$0x1] %vm918_vm2, %v916_v7 }
 0x15b PF: > { %s18_s14 = sadd.s32 1, %s1353_s14   ;;  %s2348_s9 = smov %s1337_s10 }
 0x15c   : > { %p15_p9 = scmp.ge.s32.totalorder %s18_s14, 4   ;;  %s2349_s10 = smov %s1341_s11 }
 0x15d   : > { %s2350_s11 = smov %s1424_s21  ;;  %s2351_s12 = smov %s1349_s13 }
 0x15e   : > { %s2352_s13 = smov %s2354_s16  ;;  %17 = sbr.rel (!%p15_p9) target bundleno = 6 (0x6), region = 89 }
 0x165   :  { %950 = vsyncpa [#allocation6], 1 }
 0x166   :  { %952 = vsyncpa [#allocation6 + $0x1], 1 }
 0x167   :  { %953 = vsyncpa [#allocation8], 1 }
 0x168   :  { %955 = vsyncpa [#allocation8 + $0x1], 1 }

</bundles_post_ra>
